<compile_context>
chip_gen: v5e
topology: v5e:2x2
jax: 0.10.0
libtpu: 0.0.40
codegen_flags: <defaults>
</compile_context>

<pallas_src>
import functools

import jax
import jax.numpy as jnp
from jax.experimental import pallas as pl
from jax.experimental.pallas import tpu as pltpu


def _round_up(x: int, m: int) -> int:
    return ((x + m - 1) // m) * m


def _cdiv(a: int, b: int) -> int:
    return -(-a // b)


# ----------------------------------------------------------------------------- #
# Kernel
# ----------------------------------------------------------------------------- #
def make_qnet_kernel(n_layers: int, layer0_small_k: bool):
    """Fused MLP kernel.

    Ref order: (x, w0, w1, ..., w_{L-1}, biases, out).
      * x:       (tile_b, K0)           f32  (K0 = true state_dim if layer0_small_k)
      * w_i:     (K_i, N_i)             f32 or bf16, K_i/N_i 128-multiples
                 (except w0 when layer0_small_k: true K, f32)
      * biases:  (n_layers, max_N)      f32, zero padded
      * out:     (tile_b, N_{L-1})      f32
    ReLU after every layer except the last (matches Qnet.forward).
    """

    def kernel(*refs):
        x_ref = refs[0]
        w_refs = refs[1:1 + n_layers]
        b_ref = refs[1 + n_layers]
        out_ref = refs[2 + n_layers]

        h = x_ref[...]  # f32
        for i in range(n_layers):
            w_ref = w_refs[i]
            n_out = w_ref.shape[1]  # padded out width (multiple of 128)
            if i == 0 and layer0_small_k:
                # Layer-0 contraction dim (state_dim, e.g. 4) is far below MXU
                # granularity: compute it on the VPU as an unrolled sum of rank-1
                # products.  This lets the wrapper skip lane-padding x in HBM.
                w0 = w_ref[...].astype(jnp.float32)          # (k0, n_out)
                k0 = w0.shape[0]
                acc = h[:, 0:1] * w0[0:1, :]
                for k in range(1, k0):
                    acc = acc + h[:, k:k + 1] * w0[k:k + 1, :]
                h = acc
            else:
                w = w_ref[...]
                # MXU matmul (bf16 or f32 inputs) with f32 accumulation.
                h = jnp.dot(h.astype(w.dtype), w,
                            preferred_element_type=jnp.float32)
            # Bias add + ReLU stay on the f32 accumulator (VPU-friendly on v5e too).
            h = h + b_ref[i:i + 1, :n_out].astype(jnp.float32)
            if i < n_layers - 1:
                h = jnp.maximum(h, 0.0)
        out_ref[...] = h.astype(out_ref.dtype)

    return kernel


# ----------------------------------------------------------------------------- #
# Parameter construction / padding (done ONCE, outside the per-step forward)
# ----------------------------------------------------------------------------- #
def init_qnet_params(key, state_dim, action_dim, hidden_dims):
    """PyTorch-Linear-style init (uniform +-1/sqrt(fan_in)).

    Returns a flat list [w0, b0, w1, b1, ...] with weights as [in, out]
    (pre-transposed so the forward computes y = x @ W + b)."""
    dims = [state_dim] + list(hidden_dims) + [action_dim]
    params = []
    for i in range(len(dims) - 1):
        fan_in, fan_out = dims[i], dims[i + 1]
        key, kw, kb = jax.random.split(key, 3)
        bound = 1.0 / jnp.sqrt(jnp.float32(fan_in))
        w = jax.random.uniform(kw, (fan_in, fan_out), jnp.float32, -bound, bound)
        b = jax.random.uniform(kb, (1, fan_out), jnp.float32, -bound, bound)
        params += [w, b]
    return params


def pad_qnet_params(params, compute_dtype=jnp.float32, small_k_threshold=16):
    """Pad/pack parameters for the kernel.

    Returns (weights, biases):
      * weights: tuple of n_layers arrays [K_i, N_i].  All N_i are 128-multiples.
        K_i is a 128-multiple except for layer 0 when state_dim <= small_k_threshold
        (the kernel then uses the VPU rank-1 path and x is NOT lane-padded).
        Hidden/output weights are cast to `compute_dtype` (e.g. bf16 for v6e/v7x
        MXU rate); the tiny layer-0 weight stays f32.
      * biases: single (n_layers, max_N) f32 array, zero padded.
    Zero padding is semantics-preserving (padded lanes stay exactly 0 through
    matmul + bias + ReLU) and padded output lanes are sliced off by the wrapper.
    """
    n_layers = len(params) // 2
    out_pads = [_round_up(params[2 * i].shape[1], 128) for i in range(n_layers)]
    max_out = max(out_pads)

    weights = []
    for i in range(n_layers):
        w = params[2 * i]
        fi, fo = w.shape
        po = out_pads[i]
        if i == 0 and fi <= small_k_threshold:
            pi, wdt = fi, jnp.float32           # VPU layer-0 path: true K, f32
        else:
            pi, wdt = _round_up(fi, 128), compute_dtype
        wp = jnp.zeros((pi, po), wdt).at[:fi, :fo].set(w.astype(wdt))
        weights.append(wp)

    biases = jnp.zeros((n_layers, max_out), jnp.float32)
    for i in range(n_layers):
        b = params[2 * i + 1].reshape(-1).astype(jnp.float32)
        biases = biases.at[i, : b.shape[0]].set(b)

    return tuple(weights), biases


# ----------------------------------------------------------------------------- #
# Forward pass
# ----------------------------------------------------------------------------- #
@functools.partial(jax.jit, static_argnames=("action_dim", "single_buffer_weights"))
def qnet_forward(x, weights, biases, *, action_dim, single_buffer_weights=True):
    """x: [B, state_dim] f32.  weights/biases: outputs of pad_qnet_params."""
    weights = tuple(weights)
    n_layers = len(weights)
    B, state_dim = x.shape
    k0 = weights[0].shape[0]
    out_pad = weights[-1].shape[1]
    layer0_small_k = (k0 % 128) != 0     # pad_qnet_params kept the true (tiny) K

    # --- batch tiling ---------------------------------------------------------
    # Big tiles amortize the ~0.35us/step pipeline overhead (cap 512 rows, still
    # far under VMEM).  If everything fits a single tile but B is large, split
    # into two tiles so the "parallel" batch axis can shard across both v7x TCs.
    max_tile = 512
    n_tiles = max(1, _cdiv(B, max_tile))
    if n_tiles == 1 and B >= 256:
        n_tiles = 2
    tile_b = _round_up(_cdiv(B, n_tiles), 8)     # f32 sublane multiple
    b_pad = n_tiles * tile_b
    grid = (n_tiles,)

    # --- input slab -------------------------------------------------------------
    # Small state_dim: keep x at its true lane width (no 32x-inflated HBM slab).
    if layer0_small_k:
        assert state_dim == k0, (state_dim, k0)
        x_cols = state_dim
    else:
        x_cols = k0                               # lane-dense (128 multiple)
    if b_pad == B and x_cols == state_dim and x.dtype == jnp.float32:
        x_p = x
    else:
        x_p = jnp.zeros((b_pad, x_cols), jnp.float32).at[:B, :state_dim].set(
            x.astype(jnp.float32))

    # --- VMEM budget guard (v7x: 64 MiB physical, 32 MiB default scoped) --------
    wbufs = 1 if single_buffer_weights else 2
    resident_bytes = wbufs * (sum(w.size * w.dtype.itemsize for w in weights)
                              + biases.size * biases.dtype.itemsize)
    act_bytes = 2 * 4 * tile_b * (x_cols + out_pad)            # pipelined in/out blocks
    interm_bytes = 2 * 4 * tile_b * max(w.shape[1] for w in weights)
    vmem_est = resident_bytes + act_bytes + interm_bytes
    vmem_cap = 48 * 1024 * 1024
    if vmem_est > vmem_cap:
        raise ValueError(
            f"Resident-weight Qnet kernel needs ~{vmem_est / 2**20:.1f} MiB VMEM "
            f"(> {vmem_cap / 2**20:.0f} MiB v7x budget); add a K/N grid axis or "
            "shrink tile_b / hidden_dims.")
    vmem_limit = int(min(vmem_cap, vmem_est * 1.25)) if vmem_est > (30 << 20) else None

    kernel = make_qnet_kernel(n_layers, layer0_small_k)

    # Weights/biases: constant block index -> fetched once, VMEM-resident across
    # grid steps; Buffered(1) skips the pointless second buffer.
    def _resident_spec(shape):
        if single_buffer_weights:
            return pl.BlockSpec(shape, lambda i: (0, 0), pipeline_mode=pl.Buffered(1))
        return pl.BlockSpec(shape, lambda i: (0, 0))

    in_specs = [pl.BlockSpec((tile_b, x_cols), lambda i: (i, 0))]
    in_specs += [_resident_spec(w.shape) for w in weights]
    in_specs += [_resident_spec(biases.shape)]
    out_spec = pl.BlockSpec((tile_b, out_pad), lambda i: (i, 0))

    # Advisory cost estimate so XLA can overlap this tiny call with neighbors.
    flops = 2 * b_pad * sum(w.shape[0] * w.shape[1] for w in weights)
    bytes_accessed = (x_p.size * x_p.dtype.itemsize
                      + sum(w.size * w.dtype.itemsize for w in weights)
                      + biases.size * biases.dtype.itemsize
                      + b_pad * out_pad * 4)
    cost = pl.CostEstimate(flops=flops, transcendentals=0,
                           bytes_accessed=bytes_accessed)

    out_p = pl.pallas_call(
        kernel,
        out_shape=jax.ShapeDtypeStruct((b_pad, out_pad), jnp.float32),
        grid=grid,
        in_specs=in_specs,
        out_specs=out_spec,
        compiler_params=pltpu.CompilerParams(
            dimension_semantics=("parallel",),   # megacore sharding on v7x
            vmem_limit_bytes=vmem_limit,
        ),
        cost_estimate=cost,
    )(x_p, *weights, biases)

    # Strip batch + lane padding.
    return out_p[:B, :action_dim]


# ----------------------------------------------------------------------------- #
# Pure-JAX references
# ----------------------------------------------------------------------------- #
def qnet_reference(x, params):
    """Exact f32 reference matching the PyTorch forward semantics."""
    h = x
    n_layers = len(params) // 2
    for i in range(n_layers):
        w, b = params[2 * i], params[2 * i + 1]
        h = h @ w + b
        if i < n_layers - 1:
            h = jnp.maximum(h, 0.0)
    return h


def qnet_reference_mixed(x, params, compute_dtype):
    """Mirrors the kernel's mixed-precision scheme when state_dim is tiny:
    layer 0 in f32, later layers with `compute_dtype` matmul inputs and f32
    accumulation, bias/ReLU in f32."""
    h = x.astype(jnp.float32)
    n_layers = len(params) // 2
    for i in range(n_layers):
        w, b = params[2 * i], params[2 * i + 1]
        if i == 0:
            h = jnp.dot(h, w.astype(jnp.float32), preferred_element_type=jnp.float32)
        else:
            h = jnp.dot(h.astype(compute_dtype), w.astype(compute_dtype),
                        preferred_element_type=jnp.float32)
        h = h + b.astype(jnp.float32)
        if i < n_layers - 1:
            h = jnp.maximum(h, 0.0)
    return h


# ----------------------------------------------------------------------------- #
# Demo / self-test
# ----------------------------------------------------------------------------- #
if __name__ == "__main__":
    # Module config (matches the Qnet docstring example).
    state_dim = 4
    action_dim = 2
    hidden_dims = [128, 64, 32]

    key = jax.random.PRNGKey(0)
    key, kx1, kx2 = jax.random.split(key, 3)
    params = init_qnet_params(key, state_dim, action_dim, hidden_dims)

    # Padded once, outside the per-step forward.  f32 = exact path; bf16 = the
    # v6e/v7x-preferred MXU path (f32 accumulation, so accuracy loss is tiny).
    w_f32, b_f32 = pad_qnet_params(params, jnp.float32)
    w_bf16, b_bf16 = pad_qnet_params(params, jnp.bfloat16)

    x_small = jax.random.normal(kx1, (2, state_dim), jnp.float32)    # single-env use
    x_big = jax.random.normal(kx2, (50, state_dim), jnp.float32)     # batch-grid path
    cases = [("B=2", x_small), ("B=50", x_big)]

    def run_suite(single_buffer):
        for tag, x in cases:
            ref32 = qnet_reference(x, params)

            out32 = jax.block_until_ready(
                qnet_forward(x, w_f32, b_f32, action_dim=action_dim,
                             single_buffer_weights=single_buffer))
            assert out32.shape == (x.shape[0], action_dim), (tag, out32.shape)
            assert jnp.allclose(out32, ref32, atol=1e-5, rtol=1e-5), f"f32 mismatch {tag}"

            out16 = jax.block_until_ready(
                qnet_forward(x, w_bf16, b_bf16, action_dim=action_dim,
                             single_buffer_weights=single_buffer))
            ref16 = qnet_reference_mixed(x, params, jnp.bfloat16)
            assert out16.shape == (x.shape[0], action_dim), (tag, out16.shape)
            assert jnp.allclose(out16, ref16, atol=5e-3, rtol=5e-3), f"bf16 mismatch {tag}"
            assert jnp.allclose(out16, ref32, atol=5e-2, rtol=5e-2), f"bf16 drift {tag}"

    try:
        run_suite(single_buffer=True)
    except Exception:
        # Some JAX builds reject pipeline_mode=pl.Buffered(1) on BlockSpec; fall
        # back to default double-buffered resident weights (numerically identical,
        # just a little extra VMEM).
        run_suite(single_buffer=False)

    print("KERNEL_OK")
</pallas_src>

<mosaic_0001>
module attributes {stable_mosaic.version = 11 : i64} {
  func.func @kernel(%arg0: i32, %arg1: memref<8x4xf32, #tpu.memory_space<vmem>>, %arg2: memref<4x128xf32, #tpu.memory_space<vmem>>, %arg3: memref<128x128xf32, #tpu.memory_space<vmem>>, %arg4: memref<128x128xf32, #tpu.memory_space<vmem>>, %arg5: memref<128x128xf32, #tpu.memory_space<vmem>>, %arg6: memref<4x128xf32, #tpu.memory_space<vmem>>, %arg7: memref<8x128xf32, #tpu.memory_space<vmem>>) attributes {dimension_semantics = [#tpu.dimension_semantics<parallel>], iteration_bounds = array<i64: 1>, scalar_prefetch = 0 : i64, scratch_operands = 0 : i64, tpu.core_type = #tpu.core_type<tc>, window_params = [{transform_indices = @transform_0, window_bounds = array<i64: 8, 4>}, {pipeline_mode = #tpu.pipeline_mode<synchronous>, transform_indices = @transform_1, window_bounds = array<i64: 4, 128>}, {pipeline_mode = #tpu.pipeline_mode<synchronous>, transform_indices = @transform_2, window_bounds = array<i64: 128, 128>}, {pipeline_mode = #tpu.pipeline_mode<synchronous>, transform_indices = @transform_3, window_bounds = array<i64: 128, 128>}, {pipeline_mode = #tpu.pipeline_mode<synchronous>, transform_indices = @transform_4, window_bounds = array<i64: 128, 128>}, {pipeline_mode = #tpu.pipeline_mode<synchronous>, transform_indices = @transform_5, window_bounds = array<i64: 4, 128>}, {transform_indices = @transform_6, window_bounds = array<i64: 8, 128>}]} {
    %c0 = arith.constant 0 : index
    %c0_0 = arith.constant 0 : index
    %0 = vector.load %arg1[%c0, %c0_0] : memref<8x4xf32, #tpu.memory_space<vmem>>, vector<8x4xf32>
    %c0_1 = arith.constant 0 : index
    %c0_2 = arith.constant 0 : index
    %1 = vector.load %arg2[%c0_1, %c0_2] : memref<4x128xf32, #tpu.memory_space<vmem>>, vector<4x128xf32>
    %2 = vector.extract_strided_slice %0 {offsets = [0, 0], sizes = [8, 1], strides = [1, 1]} : vector<8x4xf32> to vector<8x1xf32>
    %3 = vector.extract_strided_slice %1 {offsets = [0, 0], sizes = [1, 128], strides = [1, 1]} : vector<4x128xf32> to vector<1x128xf32>
    %4 = vector.broadcast %2 : vector<8x1xf32> to vector<8x128xf32>
    %5 = vector.broadcast %3 : vector<1x128xf32> to vector<8x128xf32>
    %6 = arith.mulf %4, %5 : vector<8x128xf32>
    %7 = vector.extract_strided_slice %0 {offsets = [0, 1], sizes = [8, 1], strides = [1, 1]} : vector<8x4xf32> to vector<8x1xf32>
    %8 = vector.extract_strided_slice %1 {offsets = [1, 0], sizes = [1, 128], strides = [1, 1]} : vector<4x128xf32> to vector<1x128xf32>
    %9 = vector.broadcast %7 : vector<8x1xf32> to vector<8x128xf32>
    %10 = vector.broadcast %8 : vector<1x128xf32> to vector<8x128xf32>
    %11 = arith.mulf %9, %10 : vector<8x128xf32>
    %12 = arith.addf %6, %11 : vector<8x128xf32>
    %13 = vector.extract_strided_slice %0 {offsets = [0, 2], sizes = [8, 1], strides = [1, 1]} : vector<8x4xf32> to vector<8x1xf32>
    %14 = vector.extract_strided_slice %1 {offsets = [2, 0], sizes = [1, 128], strides = [1, 1]} : vector<4x128xf32> to vector<1x128xf32>
    %15 = vector.broadcast %13 : vector<8x1xf32> to vector<8x128xf32>
    %16 = vector.broadcast %14 : vector<1x128xf32> to vector<8x128xf32>
    %17 = arith.mulf %15, %16 : vector<8x128xf32>
    %18 = arith.addf %12, %17 : vector<8x128xf32>
    %19 = vector.extract_strided_slice %0 {offsets = [0, 3], sizes = [8, 1], strides = [1, 1]} : vector<8x4xf32> to vector<8x1xf32>
    %20 = vector.extract_strided_slice %1 {offsets = [3, 0], sizes = [1, 128], strides = [1, 1]} : vector<4x128xf32> to vector<1x128xf32>
    %21 = vector.broadcast %19 : vector<8x1xf32> to vector<8x128xf32>
    %22 = vector.broadcast %20 : vector<1x128xf32> to vector<8x128xf32>
    %23 = arith.mulf %21, %22 : vector<8x128xf32>
    %24 = arith.addf %18, %23 : vector<8x128xf32>
    %c0_3 = arith.constant 0 : index
    %c0_4 = arith.constant 0 : index
    %25 = vector.load %arg6[%c0_3, %c0_4] : memref<4x128xf32, #tpu.memory_space<vmem>>, vector<1x128xf32>
    %26 = vector.broadcast %25 : vector<1x128xf32> to vector<8x128xf32>
    %27 = arith.addf %24, %26 : vector<8x128xf32>
    %cst = arith.constant 0.000000e+00 : f32
    %28 = vector.broadcast %cst : f32 to vector<8x128xf32>
    %29 = arith.maximumf %27, %28 : vector<8x128xf32>
    %c0_5 = arith.constant 0 : index
    %c0_6 = arith.constant 0 : index
    %30 = vector.load %arg3[%c0_5, %c0_6] : memref<128x128xf32, #tpu.memory_space<vmem>>, vector<128x128xf32>
    %cst_7 = arith.constant dense<0.000000e+00> : vector<8x128xf32>
    %31 = tpu.matmul %29, %30, %cst_7 {dimension_numbers = #tpu.dot_dimension_numbers<[1], [0], [0], [1], [0, 0, 1, 1], [], []>} : vector<8x128xf32>, vector<128x128xf32>, vector<8x128xf32> -> vector<8x128xf32>
    %c1 = arith.constant 1 : index
    %c0_8 = arith.constant 0 : index
    %32 = vector.load %arg6[%c1, %c0_8] : memref<4x128xf32, #tpu.memory_space<vmem>>, vector<1x128xf32>
    %33 = vector.broadcast %32 : vector<1x128xf32> to vector<8x128xf32>
    %34 = arith.addf %31, %33 : vector<8x128xf32>
    %cst_9 = arith.constant 0.000000e+00 : f32
    %35 = vector.broadcast %cst_9 : f32 to vector<8x128xf32>
    %36 = arith.maximumf %34, %35 : vector<8x128xf32>
    %c0_10 = arith.constant 0 : index
    %c0_11 = arith.constant 0 : index
    %37 = vector.load %arg4[%c0_10, %c0_11] : memref<128x128xf32, #tpu.memory_space<vmem>>, vector<128x128xf32>
    %cst_12 = arith.constant dense<0.000000e+00> : vector<8x128xf32>
    %38 = tpu.matmul %36, %37, %cst_12 {dimension_numbers = #tpu.dot_dimension_numbers<[1], [0], [0], [1], [0, 0, 1, 1], [], []>} : vector<8x128xf32>, vector<128x128xf32>, vector<8x128xf32> -> vector<8x128xf32>
    %c2 = arith.constant 2 : index
    %c0_13 = arith.constant 0 : index
    %39 = vector.load %arg6[%c2, %c0_13] : memref<4x128xf32, #tpu.memory_space<vmem>>, vector<1x128xf32>
    %40 = vector.broadcast %39 : vector<1x128xf32> to vector<8x128xf32>
    %41 = arith.addf %38, %40 : vector<8x128xf32>
    %cst_14 = arith.constant 0.000000e+00 : f32
    %42 = vector.broadcast %cst_14 : f32 to vector<8x128xf32>
    %43 = arith.maximumf %41, %42 : vector<8x128xf32>
    %c0_15 = arith.constant 0 : index
    %c0_16 = arith.constant 0 : index
    %44 = vector.load %arg5[%c0_15, %c0_16] : memref<128x128xf32, #tpu.memory_space<vmem>>, vector<128x128xf32>
    %cst_17 = arith.constant dense<0.000000e+00> : vector<8x128xf32>
    %45 = tpu.matmul %43, %44, %cst_17 {dimension_numbers = #tpu.dot_dimension_numbers<[1], [0], [0], [1], [0, 0, 1, 1], [], []>} : vector<8x128xf32>, vector<128x128xf32>, vector<8x128xf32> -> vector<8x128xf32>
    %c3 = arith.constant 3 : index
    %c0_18 = arith.constant 0 : index
    %46 = vector.load %arg6[%c3, %c0_18] : memref<4x128xf32, #tpu.memory_space<vmem>>, vector<1x128xf32>
    %47 = vector.broadcast %46 : vector<1x128xf32> to vector<8x128xf32>
    %48 = arith.addf %45, %47 : vector<8x128xf32>
    %c0_19 = arith.constant 0 : index
    %c0_20 = arith.constant 0 : index
    %49 = vector.load %arg7[%c0_19, %c0_20] : memref<8x128xf32, #tpu.memory_space<vmem>>, vector<8x128xf32>
    tpu.vector_store %arg7[%c0_19, %c0_20], %48 {strides = array<i32>} : memref<8x128xf32, #tpu.memory_space<vmem>>, vector<8x128xf32>,
    return
  }
  func.func @transform_0(%arg0: i32) -> (i32, i32) {
    %c0_i32 = arith.constant 0 : i32
    %c0_i32_0 = arith.constant 0 : i32
    return %arg0, %c0_i32 : i32, i32
  }
  func.func @transform_1(%arg0: i32) -> (i32, i32) {
    %c0_i32 = arith.constant 0 : i32
    %c0_i32_0 = arith.constant 0 : i32
    %c0_i32_1 = arith.constant 0 : i32
    return %c0_i32, %c0_i32_0 : i32, i32
  }
  func.func @transform_2(%arg0: i32) -> (i32, i32) {
    %c0_i32 = arith.constant 0 : i32
    %c0_i32_0 = arith.constant 0 : i32
    %c0_i32_1 = arith.constant 0 : i32
    return %c0_i32, %c0_i32_0 : i32, i32
  }
  func.func @transform_3(%arg0: i32) -> (i32, i32) {
    %c0_i32 = arith.constant 0 : i32
    %c0_i32_0 = arith.constant 0 : i32
    %c0_i32_1 = arith.constant 0 : i32
    return %c0_i32, %c0_i32_0 : i32, i32
  }
  func.func @transform_4(%arg0: i32) -> (i32, i32) {
    %c0_i32 = arith.constant 0 : i32
    %c0_i32_0 = arith.constant 0 : i32
    %c0_i32_1 = arith.constant 0 : i32
    return %c0_i32, %c0_i32_0 : i32, i32
  }
  func.func @transform_5(%arg0: i32) -> (i32, i32) {
    %c0_i32 = arith.constant 0 : i32
    %c0_i32_0 = arith.constant 0 : i32
    %c0_i32_1 = arith.constant 0 : i32
    return %c0_i32, %c0_i32_0 : i32, i32
  }
  func.func @transform_6(%arg0: i32) -> (i32, i32) {
    %c0_i32 = arith.constant 0 : i32
    %c0_i32_0 = arith.constant 0 : i32
    return %arg0, %c0_i32 : i32, i32
  }
}

module attributes {stable_mosaic.version = 11 : i64} {
  func.func @kernel(%arg0: i32, %arg1: memref<8x4xf32, #tpu.memory_space<vmem>>, %arg2: memref<4x128xf32, #tpu.memory_space<vmem>>, %arg3: memref<128x128xf32, #tpu.memory_space<vmem>>, %arg4: memref<128x128xf32, #tpu.memory_space<vmem>>, %arg5: memref<128x128xf32, #tpu.memory_space<vmem>>, %arg6: memref<4x128xf32, #tpu.memory_space<vmem>>, %arg7: memref<8x128xf32, #tpu.memory_space<vmem>>) attributes {dimension_semantics = [#tpu.dimension_semantics<parallel>], iteration_bounds = array<i64: 1>, scalar_prefetch = 0 : i64, scratch_operands = 0 : i64, tpu.core_type = #tpu.core_type<tc>, window_params = [{transform_indices = @transform_0, window_bounds = array<i64: 8, 4>}, {pipeline_mode = #tpu.pipeline_mode<synchronous>, transform_indices = @transform_1, window_bounds = array<i64: 4, 128>}, {pipeline_mode = #tpu.pipeline_mode<synchronous>, transform_indices = @transform_2, window_bounds = array<i64: 128, 128>}, {pipeline_mode = #tpu.pipeline_mode<synchronous>, transform_indices = @transform_3, window_bounds = array<i64: 128, 128>}, {pipeline_mode = #tpu.pipeline_mode<synchronous>, transform_indices = @transform_4, window_bounds = array<i64: 128, 128>}, {pipeline_mode = #tpu.pipeline_mode<synchronous>, transform_indices = @transform_5, window_bounds = array<i64: 4, 128>}, {transform_indices = @transform_6, window_bounds = array<i64: 8, 128>}]} {
    %c0 = arith.constant 0 : index
    %c0_0 = arith.constant 0 : index
    %0 = vector.load %arg1[%c0, %c0_0] : memref<8x4xf32, #tpu.memory_space<vmem>>, vector<8x4xf32>
    %c0_1 = arith.constant 0 : index
    %c0_2 = arith.constant 0 : index
    %1 = vector.load %arg2[%c0_1, %c0_2] : memref<4x128xf32, #tpu.memory_space<vmem>>, vector<4x128xf32>
    %2 = vector.extract_strided_slice %0 {offsets = [0, 0], sizes = [8, 1], strides = [1, 1]} : vector<8x4xf32> to vector<8x1xf32>
    %3 = vector.extract_strided_slice %1 {offsets = [0, 0], sizes = [1, 128], strides = [1, 1]} : vector<4x128xf32> to vector<1x128xf32>
    %4 = vector.broadcast %2 : vector<8x1xf32> to vector<8x128xf32>
    %5 = vector.broadcast %3 : vector<1x128xf32> to vector<8x128xf32>
    %6 = arith.mulf %4, %5 : vector<8x128xf32>
    %7 = vector.extract_strided_slice %0 {offsets = [0, 1], sizes = [8, 1], strides = [1, 1]} : vector<8x4xf32> to vector<8x1xf32>
    %8 = vector.extract_strided_slice %1 {offsets = [1, 0], sizes = [1, 128], strides = [1, 1]} : vector<4x128xf32> to vector<1x128xf32>
    %9 = vector.broadcast %7 : vector<8x1xf32> to vector<8x128xf32>
    %10 = vector.broadcast %8 : vector<1x128xf32> to vector<8x128xf32>
    %11 = arith.mulf %9, %10 : vector<8x128xf32>
    %12 = arith.addf %6, %11 : vector<8x128xf32>
    %13 = vector.extract_strided_slice %0 {offsets = [0, 2], sizes = [8, 1], strides = [1, 1]} : vector<8x4xf32> to vector<8x1xf32>
    %14 = vector.extract_strided_slice %1 {offsets = [2, 0], sizes = [1, 128], strides = [1, 1]} : vector<4x128xf32> to vector<1x128xf32>
    %15 = vector.broadcast %13 : vector<8x1xf32> to vector<8x128xf32>
    %16 = vector.broadcast %14 : vector<1x128xf32> to vector<8x128xf32>
    %17 = arith.mulf %15, %16 : vector<8x128xf32>
    %18 = arith.addf %12, %17 : vector<8x128xf32>
    %19 = vector.extract_strided_slice %0 {offsets = [0, 3], sizes = [8, 1], strides = [1, 1]} : vector<8x4xf32> to vector<8x1xf32>
    %20 = vector.extract_strided_slice %1 {offsets = [3, 0], sizes = [1, 128], strides = [1, 1]} : vector<4x128xf32> to vector<1x128xf32>
    %21 = vector.broadcast %19 : vector<8x1xf32> to vector<8x128xf32>
    %22 = vector.broadcast %20 : vector<1x128xf32> to vector<8x128xf32>
    %23 = arith.mulf %21, %22 : vector<8x128xf32>
    %24 = arith.addf %18, %23 : vector<8x128xf32>
    %c0_3 = arith.constant 0 : index
    %c0_4 = arith.constant 0 : index
    %25 = vector.load %arg6[%c0_3, %c0_4] : memref<4x128xf32, #tpu.memory_space<vmem>>, vector<1x128xf32>
    %26 = vector.broadcast %25 : vector<1x128xf32> to vector<8x128xf32>
    %27 = arith.addf %24, %26 : vector<8x128xf32>
    %cst = arith.constant 0.000000e+00 : f32
    %28 = vector.broadcast %cst : f32 to vector<8x128xf32>
    %29 = arith.maximumf %27, %28 : vector<8x128xf32>
    %c0_5 = arith.constant 0 : index
    %c0_6 = arith.constant 0 : index
    %30 = vector.load %arg3[%c0_5, %c0_6] : memref<128x128xf32, #tpu.memory_space<vmem>>, vector<128x128xf32>
    %cst_7 = arith.constant dense<0.000000e+00> : vector<8x128xf32>
    %31 = tpu.matmul %29, %30, %cst_7 {dimension_numbers = #tpu.dot_dimension_numbers<[1], [0], [0], [1], [0, 0, 1, 1], [], []>} : vector<8x128xf32>, vector<128x128xf32>, vector<8x128xf32> -> vector<8x128xf32>
    %c1 = arith.constant 1 : index
    %c0_8 = arith.constant 0 : index
    %32 = vector.load %arg6[%c1, %c0_8] : memref<4x128xf32, #tpu.memory_space<vmem>>, vector<1x128xf32>
    %33 = vector.broadcast %32 : vector<1x128xf32> to vector<8x128xf32>
    %34 = arith.addf %31, %33 : vector<8x128xf32>
    %cst_9 = arith.constant 0.000000e+00 : f32
    %35 = vector.broadcast %cst_9 : f32 to vector<8x128xf32>
    %36 = arith.maximumf %34, %35 : vector<8x128xf32>
    %c0_10 = arith.constant 0 : index
    %c0_11 = arith.constant 0 : index
    %37 = vector.load %arg4[%c0_10, %c0_11] : memref<128x128xf32, #tpu.memory_space<vmem>>, vector<128x128xf32>
    %cst_12 = arith.constant dense<0.000000e+00> : vector<8x128xf32>
    %38 = tpu.matmul %36, %37, %cst_12 {dimension_numbers = #tpu.dot_dimension_numbers<[1], [0], [0], [1], [0, 0, 1, 1], [], []>} : vector<8x128xf32>, vector<128x128xf32>, vector<8x128xf32> -> vector<8x128xf32>
    %c2 = arith.constant 2 : index
    %c0_13 = arith.constant 0 : index
    %39 = vector.load %arg6[%c2, %c0_13] : memref<4x128xf32, #tpu.memory_space<vmem>>, vector<1x128xf32>
    %40 = vector.broadcast %39 : vector<1x128xf32> to vector<8x128xf32>
    %41 = arith.addf %38, %40 : vector<8x128xf32>
    %cst_14 = arith.constant 0.000000e+00 : f32
    %42 = vector.broadcast %cst_14 : f32 to vector<8x128xf32>
    %43 = arith.maximumf %41, %42 : vector<8x128xf32>
    %c0_15 = arith.constant 0 : index
    %c0_16 = arith.constant 0 : index
    %44 = vector.load %arg5[%c0_15, %c0_16] : memref<128x128xf32, #tpu.memory_space<vmem>>, vector<128x128xf32>
    %cst_17 = arith.constant dense<0.000000e+00> : vector<8x128xf32>
    %45 = tpu.matmul %43, %44, %cst_17 {dimension_numbers = #tpu.dot_dimension_numbers<[1], [0], [0], [1], [0, 0, 1, 1], [], []>} : vector<8x128xf32>, vector<128x128xf32>, vector<8x128xf32> -> vector<8x128xf32>
    %c3 = arith.constant 3 : index
    %c0_18 = arith.constant 0 : index
    %46 = vector.load %arg6[%c3, %c0_18] : memref<4x128xf32, #tpu.memory_space<vmem>>, vector<1x128xf32>
    %47 = vector.broadcast %46 : vector<1x128xf32> to vector<8x128xf32>
    %48 = arith.addf %45, %47 : vector<8x128xf32>
    %c0_19 = arith.constant 0 : index
    %c0_20 = arith.constant 0 : index
    %49 = vector.load %arg7[%c0_19, %c0_20] : memref<8x128xf32, #tpu.memory_space<vmem>>, vector<8x128xf32>
    tpu.vector_store %arg7[%c0_19, %c0_20], %48 {strides = array<i32>} : memref<8x128xf32, #tpu.memory_space<vmem>>, vector<8x128xf32>,
    return
  }
  func.func @transform_0(%arg0: i32) -> (i32, i32) {
    %c0_i32 = arith.constant 0 : i32
    %c0_i32_0 = arith.constant 0 : i32
    return %arg0, %c0_i32 : i32, i32
  }
  func.func @transform_1(%arg0: i32) -> (i32, i32) {
    %c0_i32 = arith.constant 0 : i32
    %c0_i32_0 = arith.constant 0 : i32
    %c0_i32_1 = arith.constant 0 : i32
    return %c0_i32, %c0_i32_0 : i32, i32
  }
  func.func @transform_2(%arg0: i32) -> (i32, i32) {
    %c0_i32 = arith.constant 0 : i32
    %c0_i32_0 = arith.constant 0 : i32
    %c0_i32_1 = arith.constant 0 : i32
    return %c0_i32, %c0_i32_0 : i32, i32
  }
  func.func @transform_3(%arg0: i32) -> (i32, i32) {
    %c0_i32 = arith.constant 0 : i32
    %c0_i32_0 = arith.constant 0 : i32
    %c0_i32_1 = arith.constant 0 : i32
    return %c0_i32, %c0_i32_0 : i32, i32
  }
  func.func @transform_4(%arg0: i32) -> (i32, i32) {
    %c0_i32 = arith.constant 0 : i32
    %c0_i32_0 = arith.constant 0 : i32
    %c0_i32_1 = arith.constant 0 : i32
    return %c0_i32, %c0_i32_0 : i32, i32
  }
  func.func @transform_5(%arg0: i32) -> (i32, i32) {
    %c0_i32 = arith.constant 0 : i32
    %c0_i32_0 = arith.constant 0 : i32
    %c0_i32_1 = arith.constant 0 : i32
    return %c0_i32, %c0_i32_0 : i32, i32
  }
  func.func @transform_6(%arg0: i32) -> (i32, i32) {
    %c0_i32 = arith.constant 0 : i32
    %c0_i32_0 = arith.constant 0 : i32
    return %arg0, %c0_i32 : i32, i32
  }
}

</mosaic_0001>

<bundles_post_ra>
// kernel: qnet_forward.1
= control target key start
LH: loop header
LB: loop body
LE: loop exit
PB: predicated region body
PF: predicated region fallthrough
CT: control target
= control target key end

     0   :  { %11 = vsyncpa [#allocation3], 0  ;;  %s395_s0 = inlined_call_operand.vmem [shape: f32[8,4], index: 0, kind: input, shape index: {}]   ;;  %s396_s1 = inlined_call_operand.vmem [shape: f32[4,128], index: 1, kind: input, shape index: {}]   ;;  %s397_s2 = inlined_call_operand.hbm [shape: f32[128,128], index: 2, kind: input, shape index: {}]   ;;  %s398_s3 = inlined_call_operand.hbm [shape: f32[128,128], index: 3, kind: input, shape index: {}]   ;;  %s399_s4 = inlined_call_operand.hbm [shape: f32[128,128], index: 4, kind: input, shape index: {}]   ;;  %s400_s5 = inlined_call_operand.vmem [shape: f32[4,128], index: 5, kind: input, shape index: {}]   ;;  %s401_s6 = inlined_call_operand.vmem [shape: f32[8,128], index: 6, kind: output, shape index: {}]  }
   0x1   :  { %12 = vsyncpa [#allocation5], 0  ;;  %s34_s23 = sshll.u32 %s398_s3, 4  ;;  %s321_s24 = smov [#allocation4]   ;;  %s35_s23 = int_to_ptr.hbm [resolvable:$true] %s34_s23 }
   0x2   :  { %s36_s25 = sshll.u32 %s321_s24, 4  ;;  %s21_s28 = sshll.u32 %s397_s2, 4  ;;  %s37_s25 = int_to_ptr.vmem [resolvable:$true] %s36_s25  ;;  %s22_s28 = int_to_ptr.hbm [resolvable:$true] %s21_s28 }
   0x3   :  { %s322_s29 = smov 128   ;;  %s323_s30 = smov 8  }
   0x4   :  { %42 = dma.hbm_to_vmem [thread:$0]  %s35_s23, 2048, %s37_s25, [#allocation5], %s322_s29, %s322_s29, %s323_s30  }
   0x5   :  { %s324_s7 = smov [#allocation2]   ;;  %s47_s11 = sshll.u32 %s399_s4, 4  ;;  %s48_s11 = int_to_ptr.hbm [resolvable:$true] %s47_s11 }
   0x6   :  { %s23_s8 = sshll.u32 %s324_s7, 4  ;;  %s325_s3 = smov [#allocation6]   ;;  %s24_s8 = int_to_ptr.vmem [resolvable:$true] %s23_s8 }
   0x7   :  { %29 = dma.hbm_to_vmem [thread:$0]  %s22_s28, 2048, %s24_s8, [#allocation3], %s322_s29, %s322_s29, %s323_s30  }
   0x8   :  { %s49_s12 = sshll.u32 %s325_s3, 4  ;;  %s50_s12 = int_to_ptr.vmem [resolvable:$true] %s49_s12 }
   0x9   :  { %55 = dma.hbm_to_vmem [thread:$0]  %s48_s11, 2048, %s50_s12, [#allocation5], %s322_s29, %s322_s29, %s323_s30  }
   0xa   :  { %317 = dma.done.wait [#allocation3], 2048  }
   0xb   :  { %318 = vsyncadd [#allocation3], 4294965248 }
   0xc   :  { %319 = dma.done.wait [#allocation5], 4096  }
   0xd   :  { %320 = vsyncadd [#allocation5], 4294963200  ;;  %v326_v0 = vmov 0   ;;  %v327_v1 = vmov 2   ;;  %v70_v2 = vld [vmem:[%s395_s0] sm:$0xff]  ;;  %v119_v3 = vld [vmem:[#allocation2 + $0x78] sm:$0xff] }
   0xe   :  { %236 = vset.pattern.permute.xlu0 %v326_v0  ;;  %238 = vset.pattern.permute.xlu1 %v327_v1  ;;  %v118_v4 = vld [vmem:[#allocation2 + $0x70] sm:$0xff]  ;;  %v117_v5 = vld [vmem:[#allocation2 + $0x68] sm:$0xff]  ;;  %v116_v6 = vld [vmem:[#allocation2 + $0x60] sm:$0xff]  ;;  %v328_v8 = vmov 1   ;;  %v329_v9 = vmov 3  }
   0xf   :  { %74 = vperm.xlu0 %236, %v70_v2   ;;  %87 = vperm.xlu1 %238, %v70_v2   ;;  %v115_v7 = vld [vmem:[#allocation2 + $0x58] sm:$0xff]  ;;  %v114_v10 = vld [vmem:[#allocation2 + $0x50] sm:$0xff]  ;;  %v113_v11 = vld [vmem:[#allocation2 + $0x48] sm:$0xff] }
  0x10   :  { %122 = vmatpush.msra.mxu0 %v119_v3  ;;  %v112_v12 = vld [vmem:[#allocation2 + $0x40] sm:$0xff]  ;;  %v111_v13 = vld [vmem:[#allocation2 + $0x38] sm:$0xff]  ;;  %v110_v14 = vld [vmem:[#allocation2 + $0x30] sm:$0xff] }
  0x11   :  { %v109_v15 = vld [vmem:[#allocation2 + $0x28] sm:$0xff]  ;;  %v108_v16 = vld [vmem:[#allocation2 + $0x20] sm:$0xff]  ;;  %v107_v17 = vld [vmem:[#allocation2 + $0x18] sm:$0xff] }
  0x12   :  { %123 = vmatpush.msra.mxu0 %v118_v4  ;;  %v106_v18 = vld [vmem:[#allocation2 + $0x10] sm:$0xff]  ;;  %v105_v19 = vld [vmem:[#allocation2 + $0x8] sm:$0xff]  ;;  %v104_v20 = vld [vmem:[#allocation2] sm:$0xff] }
  0x13   :  { %v158_v21 = vld [vmem:[#allocation4 + $0x78] sm:$0xff]  ;;  %v157_v22 = vld [vmem:[#allocation4 + $0x70] sm:$0xff]  ;;  %v156_v23 = vld [vmem:[#allocation4 + $0x68] sm:$0xff] }
  0x14   :  { %124 = vmatpush.msra.mxu0 %v117_v5  ;;  %161 = vmatpush.msra.mxu1 %v158_v21  ;;  %v155_v24 = vld [vmem:[#allocation4 + $0x60] sm:$0xff]  ;;  %v154_v25 = vld [vmem:[#allocation4 + $0x58] sm:$0xff]  ;;  %v153_v26 = vld [vmem:[#allocation4 + $0x50] sm:$0xff] }
  0x15   :  { %v152_v29 = vld [vmem:[#allocation4 + $0x48] sm:$0xff]  ;;  %v151_v30 = vld [vmem:[#allocation4 + $0x40] sm:$0xff]  ;;  %v150_v32 = vld [vmem:[#allocation4 + $0x38] sm:$0xff] }
  0x16   :  { %125 = vmatpush.msra.mxu0 %v116_v6  ;;  %162 = vmatpush.msra.mxu1 %v157_v22  ;;  %v71_v31 = vld [vmem:[%s396_s1] sm:$0xf]  ;;  %v149_v35 = vld [vmem:[#allocation4 + $0x30] sm:$0xff]  ;;  %v148_v38 = vld [vmem:[#allocation4 + $0x28] sm:$0xff] }
  0x17   :  { %237 = vset.pattern.permute.xlu0 %v328_v8  ;;  %239 = vset.pattern.permute.xlu1 %v329_v9  ;;  %v77_v33 = vperm.slane %v71_v31, 0  ;;  %v83_v34 = vperm.slane %v71_v31, 1  ;;  %v90_v36 = vperm.slane %v71_v31, 2  ;;  %v97_v37 = vperm.slane %v71_v31, 3  ;;  %v147_v43 = vld [vmem:[#allocation4 + $0x20] sm:$0xff]  ;;  %v146_v47 = vld [vmem:[#allocation4 + $0x18] sm:$0xff] }
  0x18   :  { %80 = vperm.xlu0 %237, %v70_v2   ;;  %94 = vperm.xlu1 %239, %v70_v2   ;;  %v241_v49 = vld [vmem:[%s400_s5] ss:$0 sm:$0xff]  ;;  %v145_v53 = vld [vmem:[#allocation4 + $0x10] sm:$0xff]  ;;  %v144_v54 = vld [vmem:[#allocation4 + $0x8] sm:$0xff] }
  0x19   :  { %126 = vmatpush.msra.mxu0 %v115_v7  ;;  %163 = vmatpush.msra.mxu1 %v156_v23  ;;  %v143_v55 = vld [vmem:[#allocation4] sm:$0xff]  ;;  %v197_v56 = vld [vmem:[#allocation6 + $0x78] sm:$0xff]  ;;  %v196_v57 = vld [vmem:[#allocation6 + $0x70] sm:$0xff] }
  0x1a   :  { %200 = vmatpush.msra.mxu2 %v197_v56  ;;  %v195_v58 = vld [vmem:[#allocation6 + $0x68] sm:$0xff]  ;;  %v194_v59 = vld [vmem:[#allocation6 + $0x60] sm:$0xff]  ;;  %v193_v60 = vld [vmem:[#allocation6 + $0x58] sm:$0xff] }
  0x1b   :  { %127 = vmatpush.msra.mxu0 %v114_v10  ;;  %164 = vmatpush.msra.mxu1 %v155_v24  ;;  %v192_v61 = vld [vmem:[#allocation6 + $0x50] sm:$0xff]  ;;  %v191_v62 = vld [vmem:[#allocation6 + $0x48] sm:$0xff]  ;;  %v190_v63 = vld [vmem:[#allocation6 + $0x40] sm:$0xff] }
  0x1c   :  { %201 = vmatpush.msra.mxu2 %v196_v57  ;;  %v189_v0 = vld [vmem:[#allocation6 + $0x38] sm:$0xff]  ;;  %v188_v1 = vld [vmem:[#allocation6 + $0x30] sm:$0xff]  ;;  %v187_v2 = vld [vmem:[#allocation6 + $0x28] sm:$0xff] }
  0x1d   :  { %128 = vmatpush.msra.mxu0 %v113_v11  ;;  %165 = vmatpush.msra.mxu1 %v154_v25  ;;  %v186_v3 = vld [vmem:[#allocation6 + $0x20] sm:$0xff]  ;;  %v185_v4 = vld [vmem:[#allocation6 + $0x18] sm:$0xff]  ;;  %v183_v10 = vld [vmem:[#allocation6 + $0x8] sm:$0xff] }
  0x1e   :  { %202 = vmatpush.msra.mxu2 %v195_v58  ;;  %v242_v5 = vld [vmem:[%s400_s5 + $0x1] ss:$0 sm:$0xff] }
  0x1f   :  { %129 = vmatpush.msra.mxu0 %v112_v12  ;;  %166 = vmatpush.msra.mxu1 %v153_v26  ;;  %v182_v11 = vld [vmem:[#allocation6] sm:$0xff] }
  0x20   :  { %240 = vset.pattern.permute.xlu0 %v329_v9  ;;  %203 = vmatpush.msra.mxu2 %v194_v59  ;;  %v184_v9 = vld [vmem:[#allocation6 + $0x10] sm:$0xff]  ;;  %v243_v12 = vld [vmem:[%s400_s5 + $0x2] ss:$0 sm:$0xff] }
  0x21   :  { %130 = vmatpush.msra.mxu0 %v111_v13  ;;  %167 = vmatpush.msra.mxu1 %v152_v29 }
  0x22   :  { %204 = vmatpush.msra.mxu2 %v193_v60 }
  0x23   :  { %131 = vmatpush.msra.mxu0 %v110_v14  ;;  %168 = vmatpush.msra.mxu1 %v151_v30 }
  0x24   :  { %205 = vmatpush.msra.mxu2 %v192_v61 }
  0x25   :  { %132 = vmatpush.msra.mxu0 %v109_v15  ;;  %169 = vmatpush.msra.mxu1 %v150_v32 }
  0x26   :  { %206 = vmatpush.msra.mxu2 %v191_v62 }
  0x27   :  { %133 = vmatpush.msra.mxu0 %v108_v16  ;;  %170 = vmatpush.msra.mxu1 %v149_v35  ;;  %v244_v16 = vld [vmem:[%s400_s5 + $0x3] ss:$0 sm:$0xff] }
  0x28   :  { %207 = vmatpush.msra.mxu2 %v190_v63 }
  0x29   :  { %134 = vmatpush.msra.mxu0 %v107_v17  ;;  %171 = vmatpush.msra.mxu1 %v148_v38 }
  0x2a   :  { %208 = vmatpush.msra.mxu2 %v189_v0 }
  0x2b   :  { %135 = vmatpush.msra.mxu0 %v106_v18  ;;  %172 = vmatpush.msra.mxu1 %v147_v43 }
  0x2c   :  { %209 = vmatpush.msra.mxu2 %v188_v1 }
  0x2d   :  { %136 = vmatpush.msra.mxu0 %v105_v19  ;;  %173 = vmatpush.msra.mxu1 %v146_v47 }
  0x2e   :  { %210 = vmatpush.msra.mxu2 %v187_v2 }
  0x2f   :  { %137 = vmatpush.msra.mxu0 %v104_v20  ;;  %174 = vmatpush.msra.mxu1 %v145_v53 }
  0x30   :  { %211 = vmatpush.msra.mxu2 %v186_v3 }
  0x31   :  { %175 = vmatpush.msra.mxu1 %v144_v54 }
  0x32   :  { %212 = vmatpush.msra.mxu2 %v185_v4 }
  0x33   :  { %176 = vmatpush.msra.mxu1 %v143_v55 }
  0x34   :  { %213 = vmatpush.msra.mxu2 %v184_v9 }
  0x36   :  { %214 = vmatpush.msra.mxu2 %v183_v10 }
  0x38   :  { %215 = vmatpush.msra.mxu2 %v182_v11 }
  0x81   :  { %v75_v27 = vpop.permute.xlu0 %74  ;;  %v88_v28 = vpop.permute.xlu1 %87 }
  0x82   :  { %v78_v41 = vmul.f32 %v77_v33, %v75_v27  ;;  %v91_v44 = vmul.f32 %v90_v36, %v88_v28 }
  0x8a   :  { %v81_v39 = vpop.permute.xlu0 %80  ;;  %v95_v40 = vpop.permute.xlu1 %94 }
  0x8b   :  { %v84_v42 = vmul.f32 %v83_v34, %v81_v39  ;;  %v98_v46 = vmul.f32 %v97_v37, %v95_v40 }
  0x8d   :  { %v85_v45 = vadd.f32 %v84_v42, %v78_v41 }
  0x8f   :  { %v92_v48 = vadd.f32 %v91_v44, %v85_v45 }
  0x91   :  { %v99_v50 = vadd.f32 %v98_v46, %v92_v48 }
  0x93   :  { %v102_v51 = vadd.f32 %v241_v49, %v99_v50 }
  0x95   :  { %v103_v52 = vmax.f32 %v102_v51, 0.0 }
  0x97   :  { %138 = vmatmul.f32.vlgmr.msra.gmra.mxu0 %v103_v52 }
 0x114   :  { %v139_v6 = vpop.f32.mrf.mxu0 }
 0x115   :  { %v140_v7 = vadd.f32 %v242_v5, %v139_v6 }
 0x117   :  { %v142_v8 = vmax.f32 %v140_v7, 0.0 }
 0x119   :  { %177 = vmatmul.f32.vlgmr.msra.gmra.mxu1 %v142_v8 }
 0x196   :  { %v178_v13 = vpop.f32.mrf.mxu1 }
 0x197   :  { %v179_v14 = vadd.f32 %v243_v12, %v178_v13 }
 0x199   :  { %v181_v15 = vmax.f32 %v179_v14, 0.0 }
 0x19b   :  { %216 = vmatmul.f32.vlgmr.msra.gmra.mxu2 %v181_v15 }
 0x21e   :  { %v217_v17 = vpop.f32.mrf.mxu2 }
 0x21f   :  { %v218_v18 = vadd.f32 %v244_v16, %v217_v17 }
 0x221   :  { %220 = vst [vmem:[%s401_s6] sm:$0xff] %v218_v18 }
 0x222   :  { %225 = vsyncpa [#allocation3], 1 }
 0x223   :  { %226 = vsyncpa [#allocation5], 1 }

// kernel: qnet_forward.1
= control target key start
LH: loop header
LB: loop body
LE: loop exit
PB: predicated region body
PF: predicated region fallthrough
CT: control target
= control target key end

     0   :  { %11 = vsyncpa [#allocation3], 0  ;;  %s395_s0 = inlined_call_operand.vmem [shape: f32[8,4], index: 0, kind: input, shape index: {}]   ;;  %s396_s1 = inlined_call_operand.vmem [shape: f32[4,128], index: 1, kind: input, shape index: {}]   ;;  %s397_s2 = inlined_call_operand.hbm [shape: f32[128,128], index: 2, kind: input, shape index: {}]   ;;  %s398_s3 = inlined_call_operand.hbm [shape: f32[128,128], index: 3, kind: input, shape index: {}]   ;;  %s399_s4 = inlined_call_operand.hbm [shape: f32[128,128], index: 4, kind: input, shape index: {}]   ;;  %s400_s5 = inlined_call_operand.vmem [shape: f32[4,128], index: 5, kind: input, shape index: {}]   ;;  %s401_s6 = inlined_call_operand.vmem [shape: f32[8,128], index: 6, kind: output, shape index: {}]  }
   0x1   :  { %12 = vsyncpa [#allocation5], 0  ;;  %s34_s23 = sshll.u32 %s398_s3, 4  ;;  %s321_s24 = smov [#allocation4]   ;;  %s35_s23 = int_to_ptr.hbm [resolvable:$true] %s34_s23 }
   0x2   :  { %s36_s25 = sshll.u32 %s321_s24, 4  ;;  %s21_s28 = sshll.u32 %s397_s2, 4  ;;  %s37_s25 = int_to_ptr.vmem [resolvable:$true] %s36_s25  ;;  %s22_s28 = int_to_ptr.hbm [resolvable:$true] %s21_s28 }
   0x3   :  { %s322_s29 = smov 128   ;;  %s323_s30 = smov 8  }
   0x4   :  { %42 = dma.hbm_to_vmem [thread:$0]  %s35_s23, 2048, %s37_s25, [#allocation5], %s322_s29, %s322_s29, %s323_s30  }
   0x5   :  { %s324_s7 = smov [#allocation2]   ;;  %s47_s11 = sshll.u32 %s399_s4, 4  ;;  %s48_s11 = int_to_ptr.hbm [resolvable:$true] %s47_s11 }
   0x6   :  { %s23_s8 = sshll.u32 %s324_s7, 4  ;;  %s325_s3 = smov [#allocation6]   ;;  %s24_s8 = int_to_ptr.vmem [resolvable:$true] %s23_s8 }
   0x7   :  { %29 = dma.hbm_to_vmem [thread:$0]  %s22_s28, 2048, %s24_s8, [#allocation3], %s322_s29, %s322_s29, %s323_s30  }
   0x8   :  { %s49_s12 = sshll.u32 %s325_s3, 4  ;;  %s50_s12 = int_to_ptr.vmem [resolvable:$true] %s49_s12 }
   0x9   :  { %55 = dma.hbm_to_vmem [thread:$0]  %s48_s11, 2048, %s50_s12, [#allocation5], %s322_s29, %s322_s29, %s323_s30  }
   0xa   :  { %317 = dma.done.wait [#allocation3], 2048  }
   0xb   :  { %318 = vsyncadd [#allocation3], 4294965248 }
   0xc   :  { %319 = dma.done.wait [#allocation5], 4096  }
   0xd   :  { %320 = vsyncadd [#allocation5], 4294963200  ;;  %v326_v0 = vmov 0   ;;  %v327_v1 = vmov 2   ;;  %v70_v2 = vld [vmem:[%s395_s0] sm:$0xff]  ;;  %v119_v3 = vld [vmem:[#allocation2 + $0x78] sm:$0xff] }
   0xe   :  { %236 = vset.pattern.permute.xlu0 %v326_v0  ;;  %238 = vset.pattern.permute.xlu1 %v327_v1  ;;  %v118_v4 = vld [vmem:[#allocation2 + $0x70] sm:$0xff]  ;;  %v117_v5 = vld [vmem:[#allocation2 + $0x68] sm:$0xff]  ;;  %v116_v6 = vld [vmem:[#allocation2 + $0x60] sm:$0xff]  ;;  %v328_v8 = vmov 1   ;;  %v329_v9 = vmov 3  }
   0xf   :  { %74 = vperm.xlu0 %236, %v70_v2   ;;  %87 = vperm.xlu1 %238, %v70_v2   ;;  %v115_v7 = vld [vmem:[#allocation2 + $0x58] sm:$0xff]  ;;  %v114_v10 = vld [vmem:[#allocation2 + $0x50] sm:$0xff]  ;;  %v113_v11 = vld [vmem:[#allocation2 + $0x48] sm:$0xff] }
  0x10   :  { %122 = vmatpush.msra.mxu0 %v119_v3  ;;  %v112_v12 = vld [vmem:[#allocation2 + $0x40] sm:$0xff]  ;;  %v111_v13 = vld [vmem:[#allocation2 + $0x38] sm:$0xff]  ;;  %v110_v14 = vld [vmem:[#allocation2 + $0x30] sm:$0xff] }
  0x11   :  { %v109_v15 = vld [vmem:[#allocation2 + $0x28] sm:$0xff]  ;;  %v108_v16 = vld [vmem:[#allocation2 + $0x20] sm:$0xff]  ;;  %v107_v17 = vld [vmem:[#allocation2 + $0x18] sm:$0xff] }
  0x12   :  { %123 = vmatpush.msra.mxu0 %v118_v4  ;;  %v106_v18 = vld [vmem:[#allocation2 + $0x10] sm:$0xff]  ;;  %v105_v19 = vld [vmem:[#allocation2 + $0x8] sm:$0xff]  ;;  %v104_v20 = vld [vmem:[#allocation2] sm:$0xff] }
  0x13   :  { %v158_v21 = vld [vmem:[#allocation4 + $0x78] sm:$0xff]  ;;  %v157_v22 = vld [vmem:[#allocation4 + $0x70] sm:$0xff]  ;;  %v156_v23 = vld [vmem:[#allocation4 + $0x68] sm:$0xff] }
  0x14   :  { %124 = vmatpush.msra.mxu0 %v117_v5  ;;  %161 = vmatpush.msra.mxu1 %v158_v21  ;;  %v155_v24 = vld [vmem:[#allocation4 + $0x60] sm:$0xff]  ;;  %v154_v25 = vld [vmem:[#allocation4 + $0x58] sm:$0xff]  ;;  %v153_v26 = vld [vmem:[#allocation4 + $0x50] sm:$0xff] }
  0x15   :  { %v152_v29 = vld [vmem:[#allocation4 + $0x48] sm:$0xff]  ;;  %v151_v30 = vld [vmem:[#allocation4 + $0x40] sm:$0xff]  ;;  %v150_v32 = vld [vmem:[#allocation4 + $0x38] sm:$0xff] }
  0x16   :  { %125 = vmatpush.msra.mxu0 %v116_v6  ;;  %162 = vmatpush.msra.mxu1 %v157_v22  ;;  %v71_v31 = vld [vmem:[%s396_s1] sm:$0xf]  ;;  %v149_v35 = vld [vmem:[#allocation4 + $0x30] sm:$0xff]  ;;  %v148_v38 = vld [vmem:[#allocation4 + $0x28] sm:$0xff] }
  0x17   :  { %237 = vset.pattern.permute.xlu0 %v328_v8  ;;  %239 = vset.pattern.permute.xlu1 %v329_v9  ;;  %v77_v33 = vperm.slane %v71_v31, 0  ;;  %v83_v34 = vperm.slane %v71_v31, 1  ;;  %v90_v36 = vperm.slane %v71_v31, 2  ;;  %v97_v37 = vperm.slane %v71_v31, 3  ;;  %v147_v43 = vld [vmem:[#allocation4 + $0x20] sm:$0xff]  ;;  %v146_v47 = vld [vmem:[#allocation4 + $0x18] sm:$0xff] }
  0x18   :  { %80 = vperm.xlu0 %237, %v70_v2   ;;  %94 = vperm.xlu1 %239, %v70_v2   ;;  %v241_v49 = vld [vmem:[%s400_s5] ss:$0 sm:$0xff]  ;;  %v145_v53 = vld [vmem:[#allocation4 + $0x10] sm:$0xff]  ;;  %v144_v54 = vld [vmem:[#allocation4 + $0x8] sm:$0xff] }
  0x19   :  { %126 = vmatpush.msra.mxu0 %v115_v7  ;;  %163 = vmatpush.msra.mxu1 %v156_v23  ;;  %v143_v55 = vld [vmem:[#allocation4] sm:$0xff]  ;;  %v197_v56 = vld [vmem:[#allocation6 + $0x78] sm:$0xff]  ;;  %v196_v57 = vld [vmem:[#allocation6 + $0x70] sm:$0xff] }
  0x1a   :  { %200 = vmatpush.msra.mxu2 %v197_v56  ;;  %v195_v58 = vld [vmem:[#allocation6 + $0x68] sm:$0xff]  ;;  %v194_v59 = vld [vmem:[#allocation6 + $0x60] sm:$0xff]  ;;  %v193_v60 = vld [vmem:[#allocation6 + $0x58] sm:$0xff] }
  0x1b   :  { %127 = vmatpush.msra.mxu0 %v114_v10  ;;  %164 = vmatpush.msra.mxu1 %v155_v24  ;;  %v192_v61 = vld [vmem:[#allocation6 + $0x50] sm:$0xff]  ;;  %v191_v62 = vld [vmem:[#allocation6 + $0x48] sm:$0xff]  ;;  %v190_v63 = vld [vmem:[#allocation6 + $0x40] sm:$0xff] }
  0x1c   :  { %201 = vmatpush.msra.mxu2 %v196_v57  ;;  %v189_v0 = vld [vmem:[#allocation6 + $0x38] sm:$0xff]  ;;  %v188_v1 = vld [vmem:[#allocation6 + $0x30] sm:$0xff]  ;;  %v187_v2 = vld [vmem:[#allocation6 + $0x28] sm:$0xff] }
  0x1d   :  { %128 = vmatpush.msra.mxu0 %v113_v11  ;;  %165 = vmatpush.msra.mxu1 %v154_v25  ;;  %v186_v3 = vld [vmem:[#allocation6 + $0x20] sm:$0xff]  ;;  %v185_v4 = vld [vmem:[#allocation6 + $0x18] sm:$0xff]  ;;  %v183_v10 = vld [vmem:[#allocation6 + $0x8] sm:$0xff] }
  0x1e   :  { %202 = vmatpush.msra.mxu2 %v195_v58  ;;  %v242_v5 = vld [vmem:[%s400_s5 + $0x1] ss:$0 sm:$0xff] }
  0x1f   :  { %129 = vmatpush.msra.mxu0 %v112_v12  ;;  %166 = vmatpush.msra.mxu1 %v153_v26  ;;  %v182_v11 = vld [vmem:[#allocation6] sm:$0xff] }
  0x20   :  { %240 = vset.pattern.permute.xlu0 %v329_v9  ;;  %203 = vmatpush.msra.mxu2 %v194_v59  ;;  %v184_v9 = vld [vmem:[#allocation6 + $0x10] sm:$0xff]  ;;  %v243_v12 = vld [vmem:[%s400_s5 + $0x2] ss:$0 sm:$0xff] }
  0x21   :  { %130 = vmatpush.msra.mxu0 %v111_v13  ;;  %167 = vmatpush.msra.mxu1 %v152_v29 }
  0x22   :  { %204 = vmatpush.msra.mxu2 %v193_v60 }
  0x23   :  { %131 = vmatpush.msra.mxu0 %v110_v14  ;;  %168 = vmatpush.msra.mxu1 %v151_v30 }
  0x24   :  { %205 = vmatpush.msra.mxu2 %v192_v61 }
  0x25   :  { %132 = vmatpush.msra.mxu0 %v109_v15  ;;  %169 = vmatpush.msra.mxu1 %v150_v32 }
  0x26   :  { %206 = vmatpush.msra.mxu2 %v191_v62 }
  0x27   :  { %133 = vmatpush.msra.mxu0 %v108_v16  ;;  %170 = vmatpush.msra.mxu1 %v149_v35  ;;  %v244_v16 = vld [vmem:[%s400_s5 + $0x3] ss:$0 sm:$0xff] }
  0x28   :  { %207 = vmatpush.msra.mxu2 %v190_v63 }
  0x29   :  { %134 = vmatpush.msra.mxu0 %v107_v17  ;;  %171 = vmatpush.msra.mxu1 %v148_v38 }
  0x2a   :  { %208 = vmatpush.msra.mxu2 %v189_v0 }
  0x2b   :  { %135 = vmatpush.msra.mxu0 %v106_v18  ;;  %172 = vmatpush.msra.mxu1 %v147_v43 }
  0x2c   :  { %209 = vmatpush.msra.mxu2 %v188_v1 }
  0x2d   :  { %136 = vmatpush.msra.mxu0 %v105_v19  ;;  %173 = vmatpush.msra.mxu1 %v146_v47 }
  0x2e   :  { %210 = vmatpush.msra.mxu2 %v187_v2 }
  0x2f   :  { %137 = vmatpush.msra.mxu0 %v104_v20  ;;  %174 = vmatpush.msra.mxu1 %v145_v53 }
  0x30   :  { %211 = vmatpush.msra.mxu2 %v186_v3 }
  0x31   :  { %175 = vmatpush.msra.mxu1 %v144_v54 }
  0x32   :  { %212 = vmatpush.msra.mxu2 %v185_v4 }
  0x33   :  { %176 = vmatpush.msra.mxu1 %v143_v55 }
  0x34   :  { %213 = vmatpush.msra.mxu2 %v184_v9 }
  0x36   :  { %214 = vmatpush.msra.mxu2 %v183_v10 }
  0x38   :  { %215 = vmatpush.msra.mxu2 %v182_v11 }
  0x81   :  { %v75_v27 = vpop.permute.xlu0 %74  ;;  %v88_v28 = vpop.permute.xlu1 %87 }
  0x82   :  { %v78_v41 = vmul.f32 %v77_v33, %v75_v27  ;;  %v91_v44 = vmul.f32 %v90_v36, %v88_v28 }
  0x8a   :  { %v81_v39 = vpop.permute.xlu0 %80  ;;  %v95_v40 = vpop.permute.xlu1 %94 }
  0x8b   :  { %v84_v42 = vmul.f32 %v83_v34, %v81_v39  ;;  %v98_v46 = vmul.f32 %v97_v37, %v95_v40 }
  0x8d   :  { %v85_v45 = vadd.f32 %v84_v42, %v78_v41 }
  0x8f   :  { %v92_v48 = vadd.f32 %v91_v44, %v85_v45 }
  0x91   :  { %v99_v50 = vadd.f32 %v98_v46, %v92_v48 }
  0x93   :  { %v102_v51 = vadd.f32 %v241_v49, %v99_v50 }
  0x95   :  { %v103_v52 = vmax.f32 %v102_v51, 0.0 }
  0x97   :  { %138 = vmatmul.f32.vlgmr.msra.gmra.mxu0 %v103_v52 }
 0x114   :  { %v139_v6 = vpop.f32.mrf.mxu0 }
 0x115   :  { %v140_v7 = vadd.f32 %v242_v5, %v139_v6 }
 0x117   :  { %v142_v8 = vmax.f32 %v140_v7, 0.0 }
 0x119   :  { %177 = vmatmul.f32.vlgmr.msra.gmra.mxu1 %v142_v8 }
 0x196   :  { %v178_v13 = vpop.f32.mrf.mxu1 }
 0x197   :  { %v179_v14 = vadd.f32 %v243_v12, %v178_v13 }
 0x199   :  { %v181_v15 = vmax.f32 %v179_v14, 0.0 }
 0x19b   :  { %216 = vmatmul.f32.vlgmr.msra.gmra.mxu2 %v181_v15 }
 0x21e   :  { %v217_v17 = vpop.f32.mrf.mxu2 }
 0x21f   :  { %v218_v18 = vadd.f32 %v244_v16, %v217_v17 }
 0x221   :  { %220 = vst [vmem:[%s401_s6] sm:$0xff] %v218_v18 }
 0x222   :  { %225 = vsyncpa [#allocation3], 1 }
 0x223   :  { %226 = vsyncpa [#allocation5], 1 }

</bundles_post_ra>
